<compile_context>
chip_gen: v7x
topology: tpu7x:2x2x1
jax: 0.10.0
libtpu: 0.0.40
codegen_flags: <defaults>
</compile_context>

<pallas_src>
import functools

import jax
import jax.numpy as jnp
import numpy as np
from jax import lax
from jax.experimental import pallas as pl
from jax.experimental.pallas import tpu as pltpu


# --------------------------------------------------------------------------- #
# Fused values kernel: state model (1x1 conv + ReLU), goal model (linear +
# ReLU) and the factorized E-reduction all live in one grid step.
# --------------------------------------------------------------------------- #
def _values_kernel(state_ref, w_sT_ref, b_sT_ref, gf_ref, w_g_ref, b_g_ref,
                   out_ref, *, nb, slab):
    # state_ref : (NB, C, T_HW)  channels-major state tile (HW on the lane axis)
    # w_sT_ref  : (E, C)         transposed 1x1-conv weights of the state model
    # b_sT_ref  : (E, 1)         state bias as a column (lane-broadcast)
    # gf_ref    : (B, D)         full goal-feature matrix (tiny, resident)
    # w_g_ref   : (D, E)         goal-model weights
    # b_g_ref   : (1, E)         goal-model bias
    # out_ref   : (NB, 1, T_HW)  lane-dense values tile
    t_hw = state_ref.shape[-1]
    e = w_sT_ref.shape[0]
    n_slab = t_hw // slab

    # ---- goal model, fused (tiny: NB*D*E flops per grid step) ----
    b0 = pl.program_id(0) * nb
    gf = gf_ref[pl.ds(b0, nb), :]                                     # (NB, D)
    goal = jnp.dot(gf, w_g_ref[...], preferred_element_type=jnp.float32)
    goal = jnp.maximum(goal + b_g_ref[...], 0.0)                      # (NB, E)

    w_sT = w_sT_ref[...]                                              # (E, C)
    bias = jnp.broadcast_to(b_sT_ref[...], (e, slab))                 # hoisted broadcast

    # ---- state model + E-reduction, in <=slab-lane chunks so the f32 (E, slab)
    #      intermediate stays inside the vreg file even for huge HW tiles ----
    for n in range(nb):                                               # static, small
        g_n = goal[n:n + 1, :]                                        # (1, E)

        def body(s, carry):
            off = pl.multiple_of(s * slab, 128)
            x = state_ref[n, :, pl.ds(off, slab)]                     # (C, slab)
            emb = jnp.dot(w_sT, x, preferred_element_type=jnp.float32) + bias
            emb = jnp.maximum(emb, 0.0)                               # (E, slab)
            # (state_emb * goal_emb).sum over E == goal(1,E) @ state_emb(E,slab)
            v = jnp.dot(g_n, emb, preferred_element_type=jnp.float32)
            out_ref[n, :, pl.ds(off, slab)] = v.astype(out_ref.dtype)
            return carry

        lax.fori_loop(0, n_slab, body, 0, unroll=True if n_slab <= 16 else 8)


# --------------------------------------------------------------------------- #
# Tiling plan
# --------------------------------------------------------------------------- #
def _round_up(x, m):
    return ((x + m - 1) // m) * m


def _divisors(n):
    return [d for d in range(1, n + 1) if n % d == 0]


def _vmem_capacity_bytes(default=64 << 20):
    """Per-core VMEM; default = the smallest across v5e/v6e/v7x (64 MiB, v7x)."""
    try:
        cap = getattr(pltpu.get_tpu_info(), "vmem_capacity_bytes", None)
        if cap:
            return int(cap)
    except Exception:
        pass
    return default


def _plan_tiles(B, C, HW_pad, E):
    """Pick (NB batches/step, T_HW lanes/step, SLAB, n_state_buf, vmem_limit or None).

    The kernel is memory bound (AI ~ a few flop/byte at small C), so each grid
    step should move a large state payload (~1 MiB) to amortize the ~0.35 us
    per-step overhead, while the multi-buffered, sublane(8)-padded VMEM
    footprint stays inside the per-core budget.
    """
    f32 = 4
    c8 = _round_up(C, 8)      # state rows pad to 8 sublanes
    o8 = 8                    # the single output row pads to 8 sublanes
    e8 = _round_up(E, 8)
    n_state_buf = 3           # pl.Buffered(3) on the state stream when multi-tile
    n_out_buf = 2

    vmem_ceiling = min((_vmem_capacity_bytes() * 3) // 4, 96 << 20)
    budget = vmem_ceiling - (4 << 20)       # headroom: weights/goal/Mosaic scratch

    def footprint(nb, t):
        return (n_state_buf * nb * c8 + n_out_buf * nb * o8) * t * f32

    target = 1 << 20                        # ~1 MiB of state bytes per grid step
    lane_divs = sorted(128 * d for d in _divisors(HW_pad // 128))

    def widest_tile(nb):
        fits = [t for t in lane_divs if footprint(nb, t) <= budget]
        return max(fits) if fits else None

    # 1) one batch per step with the widest HW tile (one contiguous DMA / batch).
    nb, t = 1, widest_tile(1)
    if t is None:
        raise ValueError("a single 128-lane tile does not fit in VMEM")
    # 2) small HW: fold batches per step until the payload reaches the target.
    if nb * C * t * f32 < target:
        for d in _divisors(B):
            td = widest_tile(d)
            if td is None:
                break
            nb, t = d, td
            if nb * C * t * f32 >= target:
                break
    # 3) keep >=2 grid points when there is real work (v7x has two TensorCores).
    if (B // nb) * (HW_pad // t) == 1 and nb * C * t * f32 >= 2 * target:
        smaller = [x for x in lane_divs if x < t]
        if smaller:
            t = max(smaller)

    # Inner slab: largest multiple of 128 dividing T_HW such that the f32
    # (E, slab) intermediate is <= 64 KiB (16 vregs).
    slab_cap = max(128, ((64 * 1024) // (f32 * e8)) // 128 * 128)
    slab = 128 * max(d for d in _divisors(t // 128) if 128 * d <= slab_cap)

    # Only force a scoped-VMEM limit when the footprint actually needs it.
    need = footprint(nb, t) + (2 << 20)
    vmem_limit = None if need <= (16 << 20) else min(need + (4 << 20), vmem_ceiling)
    return nb, t, slab, n_state_buf, vmem_limit


# --------------------------------------------------------------------------- #
# Wrapper
# --------------------------------------------------------------------------- #
def values_factorized(state, objects, instructions, params):
    """state: (B, C, H, W) NCHW; objects: (B, n_obj, obj_dim); instructions: (B, seq, ins_dim)."""
    w_s, b_s, w_g, b_g = params
    B, C, H, W = state.shape
    HW = H * W
    E = w_s.shape[1]

    # ---- glue (no relayout of the big tensor) ----
    state_cm = state.reshape(B, C, HW)                 # free reshape, stays channels-major
    w_sT = jnp.transpose(w_s)                          # (E, C)  tiny
    b_sT = b_s.reshape(E, 1)                           # column bias (lane-broadcast)
    goal_feat = jnp.concatenate(
        [objects.reshape(B, -1), instructions.reshape(B, -1)], axis=-1)   # (B, D)
    D = goal_feat.shape[-1]
    # TODO(synk): feed state_cm / w_sT as bf16 (keep f32 accumulation) when the accuracy
    # budget allows; state reads dominate HBM traffic on this memory-bound kernel.

    # Lane-pad HW to a multiple of 128 so every tile is lane-dense.
    HW_pad = _round_up(HW, 128)
    if HW_pad != HW:
        state_cm = jnp.pad(state_cm, ((0, 0), (0, 0), (0, HW_pad - HW)))

    NB, T_HW, SLAB, n_state_buf, vmem_limit = _plan_tiles(B, C, HW_pad, E)
    n_b, n_hw = B // NB, HW_pad // T_HW

    state_spec_kwargs = {}
    if n_hw >= 3:
        # deeper state pipelining only pays when several HW tiles are in flight
        state_spec_kwargs["pipeline_mode"] = pl.Buffered(n_state_buf)

    compiler_kwargs = dict(dimension_semantics=("parallel", "parallel"))
    if vmem_limit is not None:
        compiler_kwargs["vmem_limit_bytes"] = int(vmem_limit)

    kernel = functools.partial(_values_kernel, nb=NB, slab=SLAB)

    out = pl.pallas_call(
        kernel,
        out_shape=jax.ShapeDtypeStruct((B, 1, HW_pad), jnp.float32),
        grid_spec=pltpu.PrefetchScalarGridSpec(
            num_scalar_prefetch=0,
            grid=(n_b, n_hw),
            in_specs=[
                pl.BlockSpec((NB, C, T_HW), lambda b, t: (b, 0, t),
                             **state_spec_kwargs),                       # state tile
                pl.BlockSpec((E, C), lambda b, t: (0, 0)),               # state weights
                pl.BlockSpec((E, 1), lambda b, t: (0, 0)),               # state bias
                pl.BlockSpec((B, D), lambda b, t: (0, 0)),               # goal feats (all B, tiny)
                pl.BlockSpec((D, E), lambda b, t: (0, 0)),               # goal weights
                pl.BlockSpec((1, E), lambda b, t: (0, 0)),               # goal bias
            ],
            out_specs=pl.BlockSpec((NB, 1, T_HW), lambda b, t: (b, 0, t)),
        ),
        compiler_params=pltpu.CompilerParams(**compiler_kwargs),
    )(state_cm, w_sT, b_sT, goal_feat, w_g, b_g)

    if HW_pad != HW:
        out = out[:, :, :HW]
    return out.reshape(B, 1, H, W)


# --------------------------------------------------------------------------- #
# Pure-JAX reference mirroring the PyTorch semantics
# --------------------------------------------------------------------------- #
def _reference(state, objects, instructions, params):
    w_s, b_s, w_g, b_g = params
    B, C, H, W = state.shape
    hp = jax.lax.Precision.HIGHEST
    x = jnp.transpose(state, (0, 2, 3, 1)).reshape(B, H * W, C)
    state_emb = jnp.maximum(jnp.dot(x, w_s, precision=hp) + b_s, 0.0)      # (B, HW, E)
    gf = jnp.concatenate([objects.reshape(B, -1), instructions.reshape(B, -1)], -1)
    goal_emb = jnp.maximum(jnp.dot(gf, w_g, precision=hp) + b_g, 0.0)      # (B, E)
    vals = jnp.sum(state_emb * goal_emb[:, None, :], axis=-1)              # (B, HW)
    return vals.reshape(B, 1, H, W)


if __name__ == "__main__":
    B, C, H, W = 2, 4, 16, 16
    E = 32
    n_obj, obj_dim = 4, 8
    seq, ins_dim = 8, 4
    D = n_obj * obj_dim + seq * ins_dim   # 64

    key = jax.random.PRNGKey(0)
    k1, k2, k3, k4, k5, k6, k7 = jax.random.split(key, 7)

    def q(x):
        # bf16-representable f32 test data: makes the check independent of the
        # MXU precision mode chosen by XLA / Mosaic for f32 matmuls.
        return x.astype(jnp.bfloat16).astype(jnp.float32)

    state = q(jax.random.normal(k1, (B, C, H, W), jnp.float32))
    objects = q(jax.random.normal(k2, (B, n_obj, obj_dim), jnp.float32))
    instructions = q(jax.random.normal(k3, (B, seq, ins_dim), jnp.float32))

    # Deterministic synthetic parameters (no checkpoint loading).
    w_s = q(jax.random.normal(k4, (C, E), jnp.float32) * 0.1)
    b_s = q(jax.random.normal(k5, (1, E), jnp.float32) * 0.1)
    w_g = q(jax.random.normal(k6, (D, E), jnp.float32) * 0.1)
    b_g = q(jax.random.normal(k7, (1, E), jnp.float32) * 0.1)
    params = (w_s, b_s, w_g, b_g)

    out = values_factorized(state, objects, instructions, params)
    out = jax.block_until_ready(out)

    ref = _reference(state, objects, instructions, params)
    np.testing.assert_allclose(np.asarray(out), np.asarray(ref), rtol=1e-5, atol=5e-5)
    assert out.shape == (B, 1, H, W)
    print("KERNEL_OK")
</pallas_src>

<mosaic_0001>
module attributes {stable_mosaic.version = 11 : i64} {
  func.func @_values_kernel(%arg0: i32, %arg1: i32, %arg2: memref<2x4x256xf32, #tpu.memory_space<vmem>>, %arg3: memref<32x4xf32, #tpu.memory_space<vmem>>, %arg4: memref<32x1xf32, #tpu.memory_space<vmem>>, %arg5: memref<2x64xf32, #tpu.memory_space<vmem>>, %arg6: memref<64x32xf32, #tpu.memory_space<vmem>>, %arg7: memref<1x32xf32, #tpu.memory_space<vmem>>, %arg8: memref<2x1x256xf32, #tpu.memory_space<vmem>>) attributes {dimension_semantics = [#tpu.dimension_semantics<parallel>, #tpu.dimension_semantics<parallel>], iteration_bounds = array<i64: 1, 1>, scalar_prefetch = 0 : i64, scratch_operands = 0 : i64, tpu.core_type = #tpu.core_type<tc>, window_params = [{transform_indices = @transform_0, window_bounds = array<i64: 2, 4, 256>}, {pipeline_mode = #tpu.pipeline_mode<synchronous>, transform_indices = @transform_1, window_bounds = array<i64: 32, 4>}, {pipeline_mode = #tpu.pipeline_mode<synchronous>, transform_indices = @transform_2, window_bounds = array<i64: 32, 1>}, {pipeline_mode = #tpu.pipeline_mode<synchronous>, transform_indices = @transform_3, window_bounds = array<i64: 2, 64>}, {pipeline_mode = #tpu.pipeline_mode<synchronous>, transform_indices = @transform_4, window_bounds = array<i64: 64, 32>}, {pipeline_mode = #tpu.pipeline_mode<synchronous>, transform_indices = @transform_5, window_bounds = array<i64: 1, 32>}, {transform_indices = @transform_6, window_bounds = array<i64: 2, 1, 256>}]} {
    %c2_i32 = arith.constant 2 : i32
    %0 = arith.muli %arg0, %c2_i32 : i32
    %1 = arith.index_cast %0 : i32 to index
    %c0 = arith.constant 0 : index
    %2 = vector.load %arg5[%1, %c0] : memref<2x64xf32, #tpu.memory_space<vmem>>, vector<2x64xf32>
    %c0_0 = arith.constant 0 : index
    %c0_1 = arith.constant 0 : index
    %3 = vector.load %arg6[%c0_0, %c0_1] : memref<64x32xf32, #tpu.memory_space<vmem>>, vector<64x32xf32>
    %cst = arith.constant dense<0.000000e+00> : vector<2x32xf32>
    %4 = tpu.matmul %2, %3, %cst {dimension_numbers = #tpu.dot_dimension_numbers<[1], [0], [0], [1], [0, 0, 1, 1], [], []>} : vector<2x64xf32>, vector<64x32xf32>, vector<2x32xf32> -> vector<2x32xf32>
    %c0_2 = arith.constant 0 : index
    %c0_3 = arith.constant 0 : index
    %5 = vector.load %arg7[%c0_2, %c0_3] : memref<1x32xf32, #tpu.memory_space<vmem>>, vector<1x32xf32>
    %6 = vector.broadcast %5 : vector<1x32xf32> to vector<2x32xf32>
    %7 = arith.addf %4, %6 : vector<2x32xf32>
    %cst_4 = arith.constant 0.000000e+00 : f32
    %8 = vector.broadcast %cst_4 : f32 to vector<2x32xf32>
    %9 = arith.maximumf %7, %8 : vector<2x32xf32>
    %c0_5 = arith.constant 0 : index
    %c0_6 = arith.constant 0 : index
    %10 = vector.load %arg3[%c0_5, %c0_6] : memref<32x4xf32, #tpu.memory_space<vmem>>, vector<32x4xf32>
    %c0_7 = arith.constant 0 : index
    %c0_8 = arith.constant 0 : index
    %11 = vector.load %arg4[%c0_7, %c0_8] : memref<32x1xf32, #tpu.memory_space<vmem>>, vector<32x1xf32>
    %12 = vector.shape_cast %11 : vector<32x1xf32> to vector<32x1xf32>
    %13 = vector.broadcast %12 : vector<32x1xf32> to vector<32x256xf32>
    %14 = vector.extract_strided_slice %9 {offsets = [0, 0], sizes = [1, 32], strides = [1, 1]} : vector<2x32xf32> to vector<1x32xf32>
    %c0_i32 = arith.constant 0 : i32
    %c256_i32 = arith.constant 256 : i32
    %15 = arith.muli %c0_i32, %c256_i32 : i32
    %16 = tpu.assume_multiple %15, 128 : i32
    %c0_9 = arith.constant 0 : index
    %c0_10 = arith.constant 0 : index
    %17 = arith.index_cast %16 : i32 to index
    %18 = vector.load %arg2[%c0_9, %c0_10, %17] : memref<2x4x256xf32, #tpu.memory_space<vmem>>, vector<1x4x256xf32>
    %19 = vector.shape_cast %18 : vector<1x4x256xf32> to vector<4x256xf32>
    %cst_11 = arith.constant dense<0.000000e+00> : vector<32x256xf32>
    %20 = tpu.matmul %10, %19, %cst_11 {dimension_numbers = #tpu.dot_dimension_numbers<[1], [0], [0], [1], [0, 0, 1, 1], [], []>} : vector<32x4xf32>, vector<4x256xf32>, vector<32x256xf32> -> vector<32x256xf32>
    %21 = arith.addf %20, %13 : vector<32x256xf32>
    %cst_12 = arith.constant 0.000000e+00 : f32
    %22 = vector.broadcast %cst_12 : f32 to vector<32x256xf32>
    %23 = arith.maximumf %21, %22 : vector<32x256xf32>
    %cst_13 = arith.constant dense<0.000000e+00> : vector<1x256xf32>
    %24 = tpu.matmul %14, %23, %cst_13 {dimension_numbers = #tpu.dot_dimension_numbers<[1], [0], [0], [1], [0, 0, 1, 1], [], []>} : vector<1x32xf32>, vector<32x256xf32>, vector<1x256xf32> -> vector<1x256xf32>
    %c0_14 = arith.constant 0 : index
    %c0_15 = arith.constant 0 : index
    %25 = arith.index_cast %16 : i32 to index
    %26 = vector.load %arg8[%c0_14, %c0_15, %25] : memref<2x1x256xf32, #tpu.memory_space<vmem>>, vector<1x1x256xf32>
    %27 = vector.shape_cast %26 : vector<1x1x256xf32> to vector<1x256xf32>
    %28 = vector.shape_cast %24 : vector<1x256xf32> to vector<1x1x256xf32>
    tpu.vector_store %arg8[%c0_14, %c0_15, %25], %28 {strides = array<i32>} : memref<2x1x256xf32, #tpu.memory_space<vmem>>, vector<1x1x256xf32>,
    %c1_i32 = arith.constant 1 : i32
    %29 = vector.extract_strided_slice %9 {offsets = [1, 0], sizes = [1, 32], strides = [1, 1]} : vector<2x32xf32> to vector<1x32xf32>
    %c0_i32_16 = arith.constant 0 : i32
    %c256_i32_17 = arith.constant 256 : i32
    %30 = arith.muli %c0_i32_16, %c256_i32_17 : i32
    %31 = tpu.assume_multiple %30, 128 : i32
    %c1 = arith.constant 1 : index
    %c0_18 = arith.constant 0 : index
    %32 = arith.index_cast %31 : i32 to index
    %33 = vector.load %arg2[%c1, %c0_18, %32] : memref<2x4x256xf32, #tpu.memory_space<vmem>>, vector<1x4x256xf32>
    %34 = vector.shape_cast %33 : vector<1x4x256xf32> to vector<4x256xf32>
    %cst_19 = arith.constant dense<0.000000e+00> : vector<32x256xf32>
    %35 = tpu.matmul %10, %34, %cst_19 {dimension_numbers = #tpu.dot_dimension_numbers<[1], [0], [0], [1], [0, 0, 1, 1], [], []>} : vector<32x4xf32>, vector<4x256xf32>, vector<32x256xf32> -> vector<32x256xf32>
    %36 = arith.addf %35, %13 : vector<32x256xf32>
    %cst_20 = arith.constant 0.000000e+00 : f32
    %37 = vector.broadcast %cst_20 : f32 to vector<32x256xf32>
    %38 = arith.maximumf %36, %37 : vector<32x256xf32>
    %cst_21 = arith.constant dense<0.000000e+00> : vector<1x256xf32>
    %39 = tpu.matmul %29, %38, %cst_21 {dimension_numbers = #tpu.dot_dimension_numbers<[1], [0], [0], [1], [0, 0, 1, 1], [], []>} : vector<1x32xf32>, vector<32x256xf32>, vector<1x256xf32> -> vector<1x256xf32>
    %c1_22 = arith.constant 1 : index
    %c0_23 = arith.constant 0 : index
    %40 = arith.index_cast %31 : i32 to index
    %41 = vector.load %arg8[%c1_22, %c0_23, %40] : memref<2x1x256xf32, #tpu.memory_space<vmem>>, vector<1x1x256xf32>
    %42 = vector.shape_cast %41 : vector<1x1x256xf32> to vector<1x256xf32>
    %43 = vector.shape_cast %39 : vector<1x256xf32> to vector<1x1x256xf32>
    tpu.vector_store %arg8[%c1_22, %c0_23, %40], %43 {strides = array<i32>} : memref<2x1x256xf32, #tpu.memory_space<vmem>>, vector<1x1x256xf32>,
    %c1_i32_24 = arith.constant 1 : i32
    return
  }
  func.func @transform_0(%arg0: i32, %arg1: i32) -> (i32, i32, i32) {
    %c0_i32 = arith.constant 0 : i32
    %c0_i32_0 = arith.constant 0 : i32
    return %arg0, %c0_i32, %arg1 : i32, i32, i32
  }
  func.func @transform_1(%arg0: i32, %arg1: i32) -> (i32, i32) {
    %c0_i32 = arith.constant 0 : i32
    %c0_i32_0 = arith.constant 0 : i32
    %c0_i32_1 = arith.constant 0 : i32
    return %c0_i32, %c0_i32_0 : i32, i32
  }
  func.func @transform_2(%arg0: i32, %arg1: i32) -> (i32, i32) {
    %c0_i32 = arith.constant 0 : i32
    %c0_i32_0 = arith.constant 0 : i32
    %c0_i32_1 = arith.constant 0 : i32
    return %c0_i32, %c0_i32_0 : i32, i32
  }
  func.func @transform_3(%arg0: i32, %arg1: i32) -> (i32, i32) {
    %c0_i32 = arith.constant 0 : i32
    %c0_i32_0 = arith.constant 0 : i32
    %c0_i32_1 = arith.constant 0 : i32
    return %c0_i32, %c0_i32_0 : i32, i32
  }
  func.func @transform_4(%arg0: i32, %arg1: i32) -> (i32, i32) {
    %c0_i32 = arith.constant 0 : i32
    %c0_i32_0 = arith.constant 0 : i32
    %c0_i32_1 = arith.constant 0 : i32
    return %c0_i32, %c0_i32_0 : i32, i32
  }
  func.func @transform_5(%arg0: i32, %arg1: i32) -> (i32, i32) {
    %c0_i32 = arith.constant 0 : i32
    %c0_i32_0 = arith.constant 0 : i32
    %c0_i32_1 = arith.constant 0 : i32
    return %c0_i32, %c0_i32_0 : i32, i32
  }
  func.func @transform_6(%arg0: i32, %arg1: i32) -> (i32, i32, i32) {
    %c0_i32 = arith.constant 0 : i32
    %c0_i32_0 = arith.constant 0 : i32
    return %arg0, %c0_i32, %arg1 : i32, i32, i32
  }
}

</mosaic_0001>

<bundles_post_ra>
// kernel: tpu_custom_call.1
= control target key start
LH: loop header
LB: loop body
LE: loop exit
PB: predicated region body
PF: predicated region fallthrough
CT: control target
= control target key end

     0   :  { %vm161_vm0 = vcmask 1043456   ;;  %v689_v3 = vmov 0.0|0.0   ;;  %v690_v6 = vmov 0.0   ;;  %vm148_vm1 = vcmask 31744   ;;  %s829_s0 = inlined_call_operand.vmem [shape: f32[2,4,256], index: 0, kind: input, shape index: {}]   ;;  %s830_s1 = inlined_call_operand.vmem [shape: f32[32,4], index: 1, kind: input, shape index: {}]   ;;  %s831_s2 = inlined_call_operand.vmem [shape: f32[32,1], index: 2, kind: input, shape index: {}]   ;;  %s832_s3 = inlined_call_operand.vmem [shape: f32[2,64], index: 3, kind: input, shape index: {}]   ;;  %s833_s4 = inlined_call_operand.vmem [shape: f32[64,32], index: 4, kind: input, shape index: {}]   ;;  %s834_s5 = inlined_call_operand.vmem [shape: f32[1,32], index: 5, kind: input, shape index: {}]   ;;  %s835_s6 = inlined_call_operand.hbm [shape: f32[2,1,256], index: 6, kind: output, shape index: {}]  }
   0x1   :  { %v27_v0 = vld [vmem:[%s833_s4] sm:$0xff]  ;;  %v28_v1 = vld [vmem:[%s833_s4 + $0x8] sm:$0xff]  ;;  %625 = vmatprep.subr.bf16.mxu0 %v689_v3  ;;  %230 = vmatprep.mubr.f32.mxu1 %v690_v6  ;;  %v29_v7 = vld [vmem:[%s833_s4 + $0x10] sm:$0xff]  ;;  %vm691_vm2 = vmmov 0   ;;  %v692_v13 = vmov 0  }
   0x2   :  { %v145_v2 = vld [vmem:[%s829_s0] sm:$0xff]  ;;  %v626_v4 = vpack.c.bf16 %v28_v1, %v27_v0  ;;  %v30_v8 = vld [vmem:[%s833_s4 + $0x18] sm:$0xff]  ;;  %622 = vmatprep.mubr.msk.f32.mxu0 %vm691_vm2, %v690_v6  ;;  %v32_v12 = vld [vmem:[%s833_s4 + $0x28] sm:$0xff]  ;;  %661 = vset.pattern.permute.xlu0 %v692_v13 }
   0x3   :  { %v147_v5 = vcombine.high %v145_v2, %v145_v2  ;;  %v117_v9 = vld [vmem:[%s830_s1] sm:$0xff]  ;;  %v629_v10 = vpack.c.bf16 %v30_v8, %v29_v7  ;;  %v123_v15 = vld [vmem:[%s831_s2 + $0x10] sm:$0xff]  ;;  %v118_v16 = vld [vmem:[%s830_s1 + $0x8] sm:$0xff] }
   0x4   :  { %627 = vmatpush3.bf16.msra.mxu0 %v626_v4  ;;  %v31_v11 = vld [vmem:[%s833_s4 + $0x20] sm:$0xff] }
   0x5   :  { %582 = vmatprep.subr.msk.mxu1 %vm161_vm0, %v147_v5  ;;  %628 = vmatprep.subr.bf16.mxu0 %v689_v3  ;;  %v121_v14 = vld [vmem:[%s831_s2] sm:$0xff] }
   0x6   :  { %583 = vmatpush1.msk.msra.mxu1 %vm161_vm0, %v145_v2  ;;  %127 = vperm.xlu0 %661, %v121_v14  }
   0x7   :  { %584 = vmatmul.mubr.msk.f32.vlgmr.msra.gmra.mrb[0].mxu1 %vm148_vm1, %v117_v9 }
   0x8   :  { %236 = vmatprep.mubr.f32.mxu1 %v690_v6 }
   0x9   :  { %11 = vsyncpa [#allocation3], 0  ;;  %630 = vmatpush3.bf16.msra.mxu0 %v629_v10  ;;  %v632_v17 = vpack.c.bf16 %v32_v12, %v31_v11  ;;  %v122_v18 = vld [vmem:[%s831_s2 + $0x8] sm:$0xff]  ;;  %662 = vset.pattern.permute.xlu1 %v692_v13  ;;  %v33_v19 = vld [vmem:[%s833_s4 + $0x30] sm:$0xff]  ;;  %vm42_vm3 = vcmask 523264   ;;  %vm263_vm4 = vcmask 261120  }
   0xa   :  { %631 = vmatprep.subr.bf16.mxu0 %v689_v3  ;;  %v34_v20 = vld [vmem:[%s833_s4 + $0x38] sm:$0xff]  ;;  %137 = vperm.xlu1 %662, %v123_v15   ;;  %v589_v21 = vld [vmem:[%s829_s0 + $0x8] sm:$0xff]  ;;  %v119_v23 = vld [vmem:[%s830_s1 + $0x10] sm:$0xff] }
   0xb   :  { %585 = vmatmul.mubr.msk.f32.gmra.mrb[2].mxu1 %vm148_vm1, %v118_v16  ;;  %v124_v22 = vld [vmem:[%s831_s2 + $0x18] sm:$0xff]  ;;  %132 = vperm.xlu0 %661, %v122_v18   ;;  %v635_v24 = vpack.c.bf16 %v34_v20, %v33_v19  ;;  %v366_v25 = vcombine.high %v589_v21, %v589_v21  ;;  %v26_v27 = vld [vmem:[%s832_s3] sm:$0x3] }
   0xc   :  { %242 = vmatprep.mubr.f32.mxu1 %v690_v6  ;;  %v120_v26 = vld [vmem:[%s830_s1 + $0x18] sm:$0xff]  ;;  %v580_v59 = vld [vmem:[%s834_s5] ss:$0 sm:$0xff]  ;;  %s694_s5 = smov [#allocation2]  }
   0xd   :  { %633 = vmatpush3.bf16.msra.mxu0 %v632_v17  ;;  %s567_s8 = sshll.u32 %s694_s5, 4  ;;  %s568_s8 = int_to_ptr.vmem [resolvable:$true] %s567_s8 }
   0xe   :  { %634 = vmatprep.subr.bf16.mxu0 %v689_v3  ;;  %142 = vperm.xlu1 %662, %v124_v22   ;;  %s665_s9 = scalar_lea.vmem %s568_s8, 64  ;;  %p670_p1 = scmp.lt.s32.totalorder %s568_s8, %s568_s8 }
   0xf   :  { %586 = vmatmul.mubr.msk.f32.gmra.mrb[4].mxu1 %vm148_vm1, %v119_v23  ;;  %p666_p0 = scmp.ne.s32.totalorder %s568_s8, %s665_s9  ;;  %p671_p2 = scmp.lt.s32.totalorder %s665_s9, %s665_s9 }
  0x10   :  { %248 = vmatprep.mubr.f32.mxu1 %v690_v6 }
  0x11   :  { %636 = vmatpush3.bf16.msra.mxu0 %v635_v24  ;;  %p672_p3 = por %p671_p2, %p670_p1 }
  0x12   :  { %590 = vmatprep.subr.msk.mxu0 %vm161_vm0, %v366_v25 }
  0x13   :  { %587 = vmatmul.mubr.msk.f32.gmra.mrb[6].mxu1 %vm148_vm1, %v120_v26  ;;  %p673_p4 = pnand %p672_p3, %p666_p0 }
  0x14   :  { %623 = vmatmul.mubr.msk.f32.vlgmr.msra.gmra.mrb[0].mxu0 %vm42_vm3, %v26_v27  ;;  %331 = vmatprep.mubr.f32.mxu1 %v690_v6 }
  0x15   :  { %591 = vmatpush1.msk.msra.mxu0 %vm161_vm0, %v589_v21  ;;  %435 = vmatprep.mubr.f32.mxu0 %v690_v6 }
  0x18   :  { %592 = vmatmul.mubr.msk.f32.vlgmr.msra.gmra.mrb[2].mxu0 %vm148_vm1, %v117_v9 }
  0x19   :  { %441 = vmatprep.mubr.f32.mxu0 %v690_v6 }
  0x1c   :  { %593 = vmatmul.mubr.msk.f32.gmra.mrb[4].mxu0 %vm148_vm1, %v118_v16 }
  0x1d   :  { %447 = vmatprep.mubr.f32.mxu0 %v690_v6 }
  0x20   :  { %594 = vmatmul.mubr.msk.f32.gmra.mrb[6].mxu0 %vm148_vm1, %v119_v23 }
  0x21   :  { %453 = vmatprep.mubr.f32.mxu0 %v690_v6 }
  0x24   :  { %595 = vmatmul.mubr.msk.f32.gmra.mrb[8].mxu0 %vm148_vm1, %v120_v26 }
  0x85   :  { %v128_v28 = vpop.permute.xlu0 %127 }
  0x89   :  { %v138_v35 = vpop.permute.xlu1 %137 }
  0x8a   :  { %v133_v33 = vpop.permute.xlu0 %132 }
  0x8d   :  { %v143_v49 = vpop.permute.xlu1 %142 }
  0xda   :  { %v232_v29 = vpop.f32.mrb[0].mxu1 }
  0xdb   :  { %v233_v30 = vadd.f32 %v232_v29, %v128_v28  ;;  %v234_v31 = vpop.f32.mrb[1].mxu1 }
  0xdc   :  { %v235_v32 = vadd.f32 %v234_v31, %v128_v28 }
  0xdd   :  { %v255_v36 = vmax.f32 %v233_v30, 0.0  ;;  %v693_v30 = vmov 1966171168  }
  0xde   :  { %v238_v34 = vpop.f32.mrb[2].mxu1  ;;  %v256_v39 = vmax.f32 %v235_v32, 0.0  ;;  %v342_v31 = vunpack.c.l.s4 %v693_v30  ;;  %v344_v32 = vlaneseq }
  0xdf   :  { %v239_v37 = vadd.f32 %v238_v34, %v133_v33  ;;  %v240_v38 = vpop.f32.mrb[3].mxu1 }
  0xe0   :  { %v241_v40 = vadd.f32 %v240_v38, %v133_v33  ;;  %v345_v34 = vshrl.u32 %v344_v32, 7  ;;  %vm358_vm5 = vcmp.lt.s32.totalorder %v344_v32, 256 }
  0xe1   :  { %v257_v41 = vmax.f32 %v239_v37, 0.0 }
  0xe2   :  { %v258_v42 = vmax.f32 %v241_v40, 0.0  ;;  %v244_v43 = vpop.f32.mrb[4].mxu1 }
  0xe3   :  { %v639_v44 = vpack.c.bf16 %v257_v41, %v255_v36  ;;  %v245_v45 = vadd.f32 %v244_v43, %v138_v35  ;;  %v246_v46 = vpop.f32.mrb[5].mxu1 }
  0xe4   :  { %v637_v47 = vpack.c.bf16 %v258_v42, %v256_v39  ;;  %v247_v48 = vadd.f32 %v246_v46, %v138_v35 }
  0xe5   :  { %v259_v51 = vmax.f32 %v245_v45, 0.0 }
  0xe6   :  { %v250_v50 = vpop.f32.mrb[6].mxu1  ;;  %638 = vmatprep.subr.bf16.mxu1 %v637_v47  ;;  %v260_v55 = vmax.f32 %v247_v48, 0.0 }
  0xe7   :  { %v251_v52 = vadd.f32 %v250_v50, %v143_v49  ;;  %v112_v53 = vpop.f32.mrb[0].mxu0  ;;  %v252_v54 = vpop.f32.mrb[7].mxu1  ;;  %640 = vmatpush1.bf16.msra.mxu1 %v639_v44 }
  0xe8   :  { %v253_v56 = vadd.f32 %v252_v54, %v143_v49  ;;  %v624_v57 = vpop.f32.mrb[1].mxu0  ;;  %v113_v63 = vadd.f32 %v580_v59, %v112_v53 }
  0xe9   :  { %v261_v58 = vmax.f32 %v251_v52, 0.0 }
  0xea   :  { %v262_v60 = vmax.f32 %v253_v56, 0.0  ;;  %v116_v5 = vmax.f32 %v113_v63, 0.0 }
  0xeb   :  { %v643_v61 = vpack.c.bf16 %v261_v58, %v259_v51  ;;  %v437_v62 = vpop.f32.mrb[2].mxu0 }
  0xec   :  { %v641_v0 = vpack.c.bf16 %v262_v60, %v260_v55  ;;  %v439_v1 = vpop.f32.mrb[3].mxu0  ;;  %v438_v2 = vadd.f32 %v437_v62, %v128_v28 }
  0xed   :  { %v440_v3 = vadd.f32 %v439_v1, %v128_v28 }
  0xee   :  { %642 = vmatprep.subr.bf16.mxu1 %v641_v0  ;;  %v460_v10 = vmax.f32 %v438_v2, 0.0 }
  0xef   :  { %644 = vmatpush1.bf16.msra.mxu1 %v643_v61  ;;  %v443_v4 = vpop.f32.mrb[4].mxu0  ;;  %v461_v12 = vmax.f32 %v440_v3, 0.0 }
  0xf0   :  { %v444_v7 = vadd.f32 %v443_v4, %v133_v33  ;;  %v445_v8 = vpop.f32.mrb[5].mxu0 }
  0xf1   :  { %v446_v9 = vadd.f32 %v445_v8, %v133_v33  ;;  %v343_v33 = vunpack.c.0.s8 %v342_v31 }
  0xf2   :  { %v462_v11 = vmax.f32 %v444_v7, 0.0  ;;  %588 = vmatmul.mubr.msk.f32.vlgmr.msra.gmra.mrb[8].mxu1 %vm263_vm4, %v116_v5 }
  0xf3   :  { %v463_v13 = vmax.f32 %v446_v9, 0.0  ;;  %v449_v14 = vpop.f32.mrb[6].mxu0  ;;  %535 = vmatprep.mubr.f32.mxu1 %v690_v6  ;;  %v468_v6 = vrot.slane %v116_v5, 1  ;;  %v346_v36 = vsub.s32 %v343_v33, %v345_v34 }
  0xf4   :  { %v647_v15 = vpack.c.bf16 %v462_v11, %v460_v10  ;;  %v451_v16 = vpop.f32.mrb[7].mxu0  ;;  %v450_v18 = vadd.f32 %v449_v14, %v138_v35 }
  0xf5   :  { %v645_v17 = vpack.c.bf16 %v463_v13, %v461_v12  ;;  %v452_v19 = vadd.f32 %v451_v16, %v138_v35 }
  0xf6   :  { %v464_v24 = vmax.f32 %v450_v18, 0.0 }
  0xf7   :  { %v455_v20 = vpop.f32.mrb[8].mxu0  ;;  %646 = vmatprep.subr.bf16.mxu1 %v645_v17  ;;  %v465_v26 = vmax.f32 %v452_v19, 0.0 }
  0xf8   :  { %v456_v21 = vadd.f32 %v455_v20, %v143_v49  ;;  %v457_v22 = vpop.f32.mrb[9].mxu0  ;;  %648 = vmatpush1.bf16.msra.mxu1 %v647_v15 }
  0xf9   :  { %v458_v23 = vadd.f32 %v457_v22, %v143_v49 }
  0xfa   :  { %v466_v25 = vmax.f32 %v456_v21, 0.0 }
  0xfb   :  { %v467_v27 = vmax.f32 %v458_v23, 0.0 }
  0xfc   :  { %v651_v28 = vpack.c.bf16 %v466_v25, %v464_v24 }
  0xfd   :  { %v649_v29 = vpack.c.bf16 %v467_v27, %v465_v26 }
  0xff   :  { %650 = vmatprep.subr.bf16.mxu1 %v649_v29 }
 0x100   :  { %652 = vmatpush1.bf16.msra.mxu1 %v651_v28 }
 0x103   :  { %596 = vmatmul.mubr.msk.f32.vlgmr.msra.gmra.mrb[10].mxu1 %vm263_vm4, %v468_v6 }
 0x1c5   :  { %v333_v35 = vpop.f32.mrb[8].mxu1 }
 0x1c6   :  { %v335_v37 = vpop.f32.mrb[9].mxu1 }
 0x1c7   :  { %v340_v38 = vcombine.low %v333_v35, %v335_v37 }
 0x1c9   :  { %v347_v39 = vrot.slane %v340_v38, %v346_v36 }
 0x1cb   :  { %v354_v40 = vrot.slane %v347_v39, %v346_v36 }
 0x1cd   :  { %360 = vst.msk [vmem:[#allocation2] sm:$0x3] %vm358_vm5, %v354_v40 }
 0x1d6   :  { %v537_v41 = vpop.f32.mrb[10].mxu1 }
 0x1d7   :  { %v539_v42 = vpop.f32.mrb[11].mxu1 }
 0x1d8   :  { %v544_v43 = vcombine.low %v537_v41, %v539_v42 }
 0x1da   :  { %v551_v44 = vrot.slane %v544_v43, %v346_v36 }
 0x1dc   :  { %v558_v45 = vrot.slane %v551_v44, %v346_v36 }
 0x1de   :  { %561 = vst.msk [vmem:[#allocation2 + $0x2] sm:$0x3] %vm358_vm5, %v558_v45 }
 0x1df   :  { %676 = shalt.err (!%p673_p4)
}
 0x1e0   :  { %s677_s12 = scalar_lea.hbm %s835_s6, 64 }
 0x1e1   :  { %p678_p5 = scmp.ne.s32.totalorder %s835_s6, %s677_s12  ;;  %p681_p6 = scmp.lt.u32.totalorder %s677_s12, %s835_s6 }
 0x1e3   :  { %p683_p7 = pnand %p681_p6, %p678_p5 }
 0x1e5   :  { %686 = shalt.err (!%p683_p7)
}
 0x1e6   :  { %s695_s17 = smov 32   ;;  %s696_s18 = smov 2  }
 0x1e7   :  { %573 = dma.vmem_to_hbm [thread:$0]  %s568_s8, 64, %s835_s6, [#allocation3], %s695_s17, %s695_s17, %s696_s18  }
 0x1e8   :  { %687 = dma.done.wait [#allocation3], 64  }
 0x1e9   :  { %688 = vsyncadd [#allocation3], 4294967232 }
 0x1ea   :  { %577 = vsyncpa [#allocation3], 1 }

</bundles_post_ra>
